<compile_context>
chip_gen: v6e
topology: v6e:2x2x1
jax: 0.10.0
libtpu: 0.0.40
codegen_flags: <defaults>
</compile_context>

<pallas_src>
import math

import jax
import jax.numpy as jnp
import numpy as np
from jax import lax
from jax.experimental import pallas as pl
from jax.experimental.pallas import tpu as pltpu


def _round_up(x, m):
    return ((x + m - 1) // m) * m


def _make_kernel(size, pad_idx, smoothing, tile_n, tile_v, v_pad,
                 ent_per_row, write_true_dist):
    confidence = 1.0 - smoothing
    fill = smoothing / (size - 2)
    need_v_mask = v_pad > size          # mask vocab-padding columns only if padded

    def kernel(x_ref, tgt_ref, loss_ref, *maybe_td_ref):
        j = pl.program_id(1)

        x = x_ref[...].astype(jnp.float32)              # (tile_n, tile_v)
        tgt = tgt_ref[...]                              # (tile_n, 1) int32

        # Global column index of every lane in this vocab tile.
        col = lax.broadcasted_iota(jnp.int32, (tile_n, tile_v), 1) + j * tile_v

        td = jnp.full((tile_n, tile_v), fill, dtype=jnp.float32)
        td = jnp.where(col == tgt, jnp.float32(confidence), td)   # scatter_(1, target, conf)
        td = jnp.where(col == pad_idx, jnp.float32(0.0), td)      # true_dist[:, pad_idx] = 0
        td = jnp.where(tgt == pad_idx, jnp.float32(0.0), td)      # zero rows whose target is pad
        if need_v_mask:
            td = jnp.where(col < size, td, jnp.float32(0.0))      # padded vocab columns

        if write_true_dist:
            maybe_td_ref[0][...] = td.astype(maybe_td_ref[0].dtype)

        # KLDiv(sum) = sum(td*log td) - sum(td*x).  sum(td*log td) is a
        # compile-time constant per non-pad row -> no logs in the kernel.
        prod = td * x                                   # (tile_n, tile_v)

        # Two-stage, (8,128)-aligned fold down to one (8,128) vreg:
        #   stage 1: collapse vocab into 128 lanes   (tile_v//128 VPU adds)
        #   stage 2: collapse rows into 8 sublanes   (tile_n//8  VPU adds)
        # All slices are tile-aligned -> no relayout, no XLU.
        row_fold = jnp.zeros((tile_n, 128), dtype=jnp.float32)
        for c0 in range(0, tile_v, 128):
            row_fold = row_fold + prod[:, c0:c0 + 128]
        folded = jnp.zeros((8, 128), dtype=jnp.float32)
        for r0 in range(0, tile_n, 8):
            folded = folded + row_fold[r0:r0 + 8, :]

        @pl.when(j == 0)
        def _init():
            nonpad = jnp.sum((tgt != pad_idx).astype(jnp.float32))
            r = lax.broadcasted_iota(jnp.int32, (8, 128), 0)
            c = lax.broadcasted_iota(jnp.int32, (8, 128), 1)
            loss_ref[...] = jnp.where((r == 0) & (c == 0),
                                      jnp.float32(ent_per_row) * nonpad,
                                      jnp.float32(0.0))

        loss_ref[...] = loss_ref[...] - folded

    return kernel


def label_smoothing_loss(x, target, *, size, pad_idx, smoothing,
                         tile_n=None, tile_v=None, return_true_dist=False):
    """x: [N, size] log-probabilities (any float dtype), target: [N] int.
    Returns loss (and true_dist [N, size] in x.dtype if return_true_dist)."""
    assert x.ndim == 2
    N, V = x.shape
    assert V == size
    confidence = 1.0 - smoothing
    fill = smoothing / (size - 2)

    # --- tile sizing: lane-dense vocab tiles, sublane-aligned row tiles ---
    if tile_v is None:
        tile_v = 1024            # keeps VMEM modest even on v7x (64 MiB)
    tile_v = min(_round_up(tile_v, 128), _round_up(V, 128))
    if tile_n is None:
        tile_n = 256
    tile_n = min(_round_up(tile_n, 8), _round_up(N, 8))

    n_pad = _round_up(N, tile_n)
    v_pad = _round_up(V, tile_v)
    grid = (n_pad // tile_n, v_pad // tile_v)

    # --- pad inputs; padded rows get target == pad_idx so they contribute 0 ---
    x_p = x
    if (n_pad, v_pad) != (N, V):
        x_p = jnp.pad(x, ((0, n_pad - N), (0, v_pad - V)))
    tgt = jnp.full((n_pad, 1), pad_idx, dtype=jnp.int32)
    tgt = tgt.at[:N, 0].set(target.astype(jnp.int32))

    # Closed-form sum(td * log(td)) for one non-pad row (compile-time constant).
    ent_per_row = 0.0
    if confidence > 0.0:
        ent_per_row += confidence * math.log(confidence)
    if fill > 0.0:
        ent_per_row += (size - 2) * fill * math.log(fill)

    kernel = _make_kernel(size, pad_idx, smoothing, tile_n, tile_v, v_pad,
                          ent_per_row, return_true_dist)

    out_shape = [jax.ShapeDtypeStruct((grid[0] * 8, 128), jnp.float32)]
    out_specs = [pl.BlockSpec((8, 128), lambda i, j: (i, 0))]
    if return_true_dist:
        out_shape.append(jax.ShapeDtypeStruct((n_pad, v_pad), x.dtype))
        out_specs.append(pl.BlockSpec((tile_n, tile_v), lambda i, j: (i, j)))

    td_bytes = x.dtype.itemsize if return_true_dist else 0
    tile_bytes = tile_n * tile_v * (x.dtype.itemsize + td_bytes)
    vmem_limit = int(min(64 * 2 ** 20, max(16 * 2 ** 20, 3 * tile_bytes)))

    cost = pl.CostEstimate(
        flops=3 * n_pad * v_pad,
        transcendentals=0,
        bytes_accessed=(n_pad * v_pad * (x.dtype.itemsize + td_bytes)
                        + n_pad * 4 + grid[0] * 8 * 128 * 4),
    )

    outs = pl.pallas_call(
        kernel,
        out_shape=tuple(out_shape),
        grid=grid,
        in_specs=[
            pl.BlockSpec((tile_n, tile_v), lambda i, j: (i, j)),   # x tile
            pl.BlockSpec((tile_n, 1), lambda i, j: (i, 0)),        # targets (per row tile)
        ],
        out_specs=tuple(out_specs),
        compiler_params=pltpu.CompilerParams(
            dimension_semantics=("parallel", "arbitrary"),
            vmem_limit_bytes=vmem_limit,
        ),
        cost_estimate=cost,
    )(x_p, tgt)

    loss = jnp.sum(outs[0])
    if return_true_dist:
        return loss, outs[1][:N, :V]
    return loss


def _reference(x, target, size, pad_idx, smoothing):
    """Pure-JAX reference mirroring the PyTorch module + KLDivLoss(sum)."""
    confidence = 1.0 - smoothing
    N, V = x.shape
    td = jnp.full((N, V), smoothing / (size - 2), jnp.float32)
    td = td.at[jnp.arange(N), target].set(confidence)
    td = td.at[:, pad_idx].set(0.0)
    td = jnp.where((target == pad_idx)[:, None], 0.0, td)
    xlogy = jnp.where(td > 0, td * jnp.log(td), 0.0)
    return jnp.sum(xlogy - td * x.astype(jnp.float32)), td


if __name__ == "__main__":
    # Small demo: 13 tokens, vocab 250 (exercises row/vocab padding, multi-tile
    # grid, per-tile column offsets, and the accumulate-then-finalize loss).
    N, V = 13, 250
    pad_idx = 0
    smoothing = 0.1

    key = jax.random.PRNGKey(0)
    kx, kt = jax.random.split(key)
    logits = jax.random.normal(kx, (N, V), dtype=jnp.float32)
    x = jax.nn.log_softmax(logits, axis=-1)                 # log-probabilities
    target = jax.random.randint(kt, (N,), 0, V, dtype=jnp.int32)
    target = target.at[3].set(pad_idx)                      # include a padded row

    # Full path (loss + true_dist), tiled 8x128 -> grid (2, 2).
    loss, true_dist = label_smoothing_loss(
        x, target, size=V, pad_idx=pad_idx, smoothing=smoothing,
        tile_n=8, tile_v=128, return_true_dist=True)
    # Loss-only fast path, explicit small tiles (multi-tile grid).
    loss_only = label_smoothing_loss(
        x, target, size=V, pad_idx=pad_idx, smoothing=smoothing,
        tile_n=8, tile_v=128)
    # Loss-only fast path with default tile sizing (single-tile grid).
    loss_default = label_smoothing_loss(
        x, target, size=V, pad_idx=pad_idx, smoothing=smoothing)

    loss = jax.block_until_ready(loss)
    true_dist = jax.block_until_ready(true_dist)
    loss_only = jax.block_until_ready(loss_only)
    loss_default = jax.block_until_ready(loss_default)

    ref_loss, ref_td = _reference(x, target, V, pad_idx, smoothing)
    assert np.allclose(np.asarray(loss), np.asarray(ref_loss), rtol=1e-4, atol=1e-4)
    assert np.allclose(np.asarray(loss_only), np.asarray(ref_loss), rtol=1e-4, atol=1e-4)
    assert np.allclose(np.asarray(loss_default), np.asarray(ref_loss), rtol=1e-4, atol=1e-4)
    assert np.allclose(np.asarray(true_dist), np.asarray(ref_td), rtol=1e-6, atol=1e-6)

    print("KERNEL_OK")
</pallas_src>

<mosaic_0001>
module attributes {stable_mosaic.version = 11 : i64} {
  func.func @kernel(%arg0: i32, %arg1: i32, %arg2: memref<8x128xf32, #tpu.memory_space<vmem>>, %arg3: memref<8x1xi32, #tpu.memory_space<vmem>>, %arg4: memref<8x128xf32, #tpu.memory_space<vmem>>, %arg5: memref<8x128xf32, #tpu.memory_space<vmem>>) attributes {dimension_semantics = [#tpu.dimension_semantics<parallel>, #tpu.dimension_semantics<arbitrary>], iteration_bounds = array<i64: 2, 2>, scalar_prefetch = 0 : i64, scratch_operands = 0 : i64, tpu.core_type = #tpu.core_type<tc>, window_params = [{transform_indices = @transform_0, window_bounds = array<i64: 8, 128>}, {transform_indices = @transform_1, window_bounds = array<i64: 8, 1>}, {transform_indices = @transform_2, window_bounds = array<i64: 8, 128>}, {transform_indices = @transform_3, window_bounds = array<i64: 8, 128>}]} {
    %c0 = arith.constant 0 : index
    %c0_0 = arith.constant 0 : index
    %0 = vector.load %arg2[%c0, %c0_0] : memref<8x128xf32, #tpu.memory_space<vmem>>, vector<8x128xf32>
    %c0_1 = arith.constant 0 : index
    %c0_2 = arith.constant 0 : index
    %1 = vector.load %arg3[%c0_1, %c0_2] : memref<8x1xi32, #tpu.memory_space<vmem>>, vector<8x1xi32>
    %2 = tpu.iota {dimensions = array<i32: 1>} : vector<8x128xi32>
    %c128_i32 = arith.constant 128 : i32
    %3 = arith.muli %arg1, %c128_i32 : i32
    %4 = vector.broadcast %3 : i32 to vector<8x128xi32>
    %5 = arith.addi %2, %4 : vector<8x128xi32>
    %cst = arith.constant 4.032258E-4 : f32
    %6 = vector.broadcast %cst : f32 to vector<8x128xf32>
    %7 = vector.broadcast %1 : vector<8x1xi32> to vector<8x128xi32>
    %8 = arith.cmpi eq, %5, %7 : vector<8x128xi32>
    %cst_3 = arith.constant 0.899999976 : f32
    %9 = vector.broadcast %cst_3 : f32 to vector<8x128xf32>
    %10 = arith.select %8, %9, %6 : vector<8x128xi1>, vector<8x128xf32>
    %c0_i32 = arith.constant 0 : i32
    %11 = vector.broadcast %c0_i32 : i32 to vector<8x128xi32>
    %12 = arith.cmpi eq, %5, %11 : vector<8x128xi32>
    %cst_4 = arith.constant 0.000000e+00 : f32
    %13 = vector.broadcast %cst_4 : f32 to vector<8x128xf32>
    %14 = arith.select %12, %13, %10 : vector<8x128xi1>, vector<8x128xf32>
    %c0_i32_5 = arith.constant 0 : i32
    %15 = vector.broadcast %c0_i32_5 : i32 to vector<8x1xi32>
    %16 = arith.cmpi eq, %1, %15 : vector<8x1xi32>
    %cst_6 = arith.constant 0.000000e+00 : f32
    %17 = vector.shape_cast %16 : vector<8x1xi1> to vector<8x1xi1>
    %18 = vector.broadcast %17 : vector<8x1xi1> to vector<8x128xi1>
    %19 = vector.broadcast %cst_6 : f32 to vector<8x128xf32>
    %20 = arith.select %18, %19, %14 : vector<8x128xi1>, vector<8x128xf32>
    %c250_i32 = arith.constant 250 : i32
    %21 = vector.broadcast %c250_i32 : i32 to vector<8x128xi32>
    %22 = arith.cmpi slt, %5, %21 : vector<8x128xi32>
    %cst_7 = arith.constant 0.000000e+00 : f32
    %23 = vector.broadcast %cst_7 : f32 to vector<8x128xf32>
    %24 = arith.select %22, %20, %23 : vector<8x128xi1>, vector<8x128xf32>
    %c0_8 = arith.constant 0 : index
    %c0_9 = arith.constant 0 : index
    %25 = vector.load %arg5[%c0_8, %c0_9] : memref<8x128xf32, #tpu.memory_space<vmem>>, vector<8x128xf32>
    tpu.vector_store %arg5[%c0_8, %c0_9], %24 {strides = array<i32>} : memref<8x128xf32, #tpu.memory_space<vmem>>, vector<8x128xf32>,
    %26 = arith.mulf %24, %0 : vector<8x128xf32>
    %cst_10 = arith.constant 0.000000e+00 : f32
    %27 = vector.broadcast %cst_10 : f32 to vector<8x128xf32>
    %28 = arith.addf %27, %26 : vector<8x128xf32>
    %cst_11 = arith.constant 0.000000e+00 : f32
    %29 = vector.broadcast %cst_11 : f32 to vector<8x128xf32>
    %30 = arith.addf %29, %28 : vector<8x128xf32>
    %c0_i32_12 = arith.constant 0 : i32
    %31 = arith.cmpi eq, %arg1, %c0_i32_12 : i32
    %32 = arith.extui %31 : i1 to i32
    %c0_i32_13 = arith.constant 0 : i32
    %33 = arith.cmpi ne, %32, %c0_i32_13 : i32
    scf.if %33 {
      %c0_i32_18 = arith.constant 0 : i32
      %37 = vector.broadcast %c0_i32_18 : i32 to vector<8x1xi32>
      %38 = arith.cmpi ne, %1, %37 : vector<8x1xi32>
      %39 = arith.extui %38 : vector<8x1xi1> to vector<8x1xi32>
      %40 = arith.sitofp %39 : vector<8x1xi32> to vector<8x1xf32>
      %41 = vector.shape_cast %40 : vector<8x1xf32> to vector<1x8x1xf32>
      %cst_19 = arith.constant dense<0.000000e+00> : vector<1xf32>
      %42 = vector.multi_reduction <add>, %41, %cst_19 [1, 2] : vector<1x8x1xf32> to vector<1xf32>
      %43 = vector.shape_cast %42 : vector<1xf32> to vector<1x1x1xf32>
      %44 = vector.extract %43[0, 0, 0] : f32 from vector<1x1x1xf32>
      %45 = tpu.iota {dimensions = array<i32: 0>} : vector<8x128xi32>
      %46 = tpu.iota {dimensions = array<i32: 1>} : vector<8x128xi32>
      %c0_i32_20 = arith.constant 0 : i32
      %47 = vector.broadcast %c0_i32_20 : i32 to vector<8x128xi32>
      %48 = arith.cmpi eq, %45, %47 : vector<8x128xi32>
      %c0_i32_21 = arith.constant 0 : i32
      %49 = vector.broadcast %c0_i32_21 : i32 to vector<8x128xi32>
      %50 = arith.cmpi eq, %46, %49 : vector<8x128xi32>
      %51 = arith.andi %48, %50 : vector<8x128xi1>
      %cst_22 = arith.constant -0.876425862 : f32
      %52 = arith.mulf %cst_22, %44 : f32
      %cst_23 = arith.constant 0.000000e+00 : f32
      %53 = vector.broadcast %52 : f32 to vector<8x128xf32>
      %54 = vector.broadcast %cst_23 : f32 to vector<8x128xf32>
      %55 = arith.select %51, %53, %54 : vector<8x128xi1>, vector<8x128xf32>
      %c0_24 = arith.constant 0 : index
      %c0_25 = arith.constant 0 : index
      %56 = vector.load %arg4[%c0_24, %c0_25] : memref<8x128xf32, #tpu.memory_space<vmem>>, vector<8x128xf32>
      tpu.vector_store %arg4[%c0_24, %c0_25], %55 {strides = array<i32>} : memref<8x128xf32, #tpu.memory_space<vmem>>, vector<8x128xf32>,
    } else {
    }
    %c0_14 = arith.constant 0 : index
    %c0_15 = arith.constant 0 : index
    %34 = vector.load %arg4[%c0_14, %c0_15] : memref<8x128xf32, #tpu.memory_space<vmem>>, vector<8x128xf32>
    %35 = arith.subf %34, %30 : vector<8x128xf32>
    %c0_16 = arith.constant 0 : index
    %c0_17 = arith.constant 0 : index
    %36 = vector.load %arg4[%c0_16, %c0_17] : memref<8x128xf32, #tpu.memory_space<vmem>>, vector<8x128xf32>
    tpu.vector_store %arg4[%c0_16, %c0_17], %35 {strides = array<i32>} : memref<8x128xf32, #tpu.memory_space<vmem>>, vector<8x128xf32>,
    return
  }
  func.func @transform_0(%arg0: i32, %arg1: i32) -> (i32, i32) {
    %c0_i32 = arith.constant 0 : i32
    return %arg0, %arg1 : i32, i32
  }
  func.func @transform_1(%arg0: i32, %arg1: i32) -> (i32, i32) {
    %c0_i32 = arith.constant 0 : i32
    %c0_i32_0 = arith.constant 0 : i32
    return %arg0, %c0_i32 : i32, i32
  }
  func.func @transform_2(%arg0: i32, %arg1: i32) -> (i32, i32) {
    %c0_i32 = arith.constant 0 : i32
    %c0_i32_0 = arith.constant 0 : i32
    return %arg0, %c0_i32 : i32, i32
  }
  func.func @transform_3(%arg0: i32, %arg1: i32) -> (i32, i32) {
    %c0_i32 = arith.constant 0 : i32
    return %arg0, %arg1 : i32, i32
  }
}

</mosaic_0001>

<bundles_post_ra>
// kernel: tpu_custom_call.1
= control target key start
LH: loop header
LB: loop body
LE: loop exit
PB: predicated region body
PF: predicated region fallthrough
CT: control target
= control target key end

     0   :  { %9 = vsyncpa [#allocation3], 0  ;;  %s1058_s0 = inlined_call_operand.hbm [shape: f32[16,256], index: 0, kind: input, shape index: {}]   ;;  %s1059_s1 = inlined_call_operand.vmem [shape: s32[16,1], index: 1, kind: input, shape index: {}]   ;;  %s1060_s2 = inlined_call_operand.hbm [shape: f32[16,128], index: 2, kind: output, shape index: {0}]   ;;  %s1061_s3 = inlined_call_operand.hbm [shape: f32[16,256], index: 3, kind: output, shape index: {1}]  }
   0x1   :  { %11 = vsyncpa [#allocation3 + $0x1], 0 }
   0x2   :  { %12 = vsyncpa [#allocation4], 0 }
   0x3   :  { %14 = vsyncpa [#allocation4 + $0x1], 0 }
   0x4   :  { %15 = vsyncpa [#allocation7], 0 }
   0x5   :  { %17 = vsyncpa [#allocation7 + $0x1], 0  ;;  %s793_s12 = smov 0   ;;  %s795_s13 = smov 0  }
   0x6   :  { %s797_s14 = smov 0   ;;  %s799_s15 = smov 0  }
   0x7   :  { %s801_s16 = smov 0   ;;  %s803_s17 = smov 0  }
   0x8   :  { %s805_s18 = smov 0   ;;  %s807_s19 = smov 0  }
   0x9   :  { %s809_s20 = smov 0   ;;  %s811_s21 = smov 0  }
   0xa   :  { %s813_s22 = smov 0  }
   0xb LB: > { %1067 = sst [smem:[#allocation11_spill]] %s733_s14  ;;  %s452_s23 = sadd.s32 4294967295, %s765_s22   ;;  %s765_s22 = sphi %s813_s22, %s23_s22   ;;  %s761_s21 = sphi %s811_s21, %s1096_s21   ;;  %s757_s20 = sphi %s809_s20, %s1095_s20   ;;  %s753_s19 = sphi %s807_s19, %s1094_s19   ;;  %s749_s18 = sphi %s805_s18, %s1093_s18   ;;  %s745_s17 = sphi %s803_s17, %s1086_s17   ;;  %s741_s16 = sphi %s801_s16, %s1092_s16   ;;  %s737_s15 = sphi %s799_s15, %s1091_s15   ;;  %s733_s14 = sphi %s797_s14, %s1084_s14   ;;  %s729_s13 = sphi %s795_s13, %s1090_s13   ;;  %s725_s12 = sphi %s793_s12, %s1089_s12  }
   0xc   : > { %1068 = sst [smem:[#allocation12_spill]] %s745_s17  ;;  %s453_s24 = sadd.s32 4294967294, %s765_s22  }
   0xd   : > { %s32_s25 = sadd.s32 1, %s757_s20  ;;  %s35_s26 = sadd.s32 1, %s761_s21 }
   0xe   : > { %p33_p0 = scmp.ge.s32.totalorder %s32_s25, 2  ;;  %s44_s27 = sadd.s32 1, %s745_s17 }
   0xf   : > { %p51_p1 = scmp.ne.s32.totalorder %s745_s17, %s741_s16  ;;  %p52_p2 = scmp.eq.s32.totalorder %s765_s22, 0 }
  0x10   : > { %s1098_s25 = smov (%p33_p0, %s32_s25), 0  ;;  %s1100_s26 = smov (!%p33_p0, %s35_s26), %s761_s21 }
  0x11   : > { %1069 = sst [smem:[#allocation13_spill]] %s1098_s25  ;;  %s40_s28 = ssub.s32 %s757_s20, %s1098_s25 }
  0x12   : > { %p864_p3 = por %p52_p2, %p51_p1  ;;  %p37_p4 = scmp.ge.s32.totalorder %s1100_s26, 2 }
  0x13   : > { %p57_p5 = scmp.ne.s32.totalorder %s741_s16, %s737_s15  ;;  %p58_p6 = scmp.eq.s32.totalorder %s452_s23, 0 }
  0x14   : > { %s96_s30 = sadd.s32 1, %s733_s14  ;;  %s1102_s26 = smov (%p37_p4, %s1100_s26), 0 }
  0x15   : > { %1071 = sst [smem:[#allocation14_spill]] %s1102_s26  ;;  %p876_p7 = por %p58_p6, %p57_p5 }
  0x16   : > { %p106_p8 = scmp.ne.s32.totalorder %s733_s14, %s729_s13  ;;  %s39_s5 = ssub.s32 %s761_s21, %s1102_s26 }
  0x17   : > { %p107_p9 = scmp.eq.s32.totalorder %s452_s23, 3  ;;  %s41_s6 = sor.u32 %s40_s28, %s39_s5 }
  0x18   : > { %p94_p10 = scmp.eq.s32.totalorder %s39_s5, 0  ;;  %p42_p11 = scmp.eq.s32.totalorder %s41_s6, 0 }
  0x19   : > { %p884_p12 = por %p107_p9, %p106_p8  ;;  %p112_p13 = scmp.ne.s32.totalorder %s729_s13, %s725_s12 }
  0x1a   : > { %s889_s8 = scalar_select %p94_p10, %s733_s14, %s96_s30  }
  0x1b   : > { %s892_s9 = scalar_select %p42_p11, %s745_s17, %s44_s27  }
  0x1c   : > { %1074 = sst [smem:[#allocation15_spill]] %s889_s8  ;;  %p113_p0 = scmp.eq.s32.totalorder %s453_s24, 3 }
  0x1d   : > { %1075 = sst [smem:[#allocation16_spill]] %s892_s9  ;;  %p899_p2 = por %p107_p9, %p51_p1 }
  0x1e   : > { %p903_p4 = por %p113_p0, %p112_p13  ;;  %p910_p6 = por %p113_p0, %p57_p5 }
  0x1f   : > { %s1076_s10 = scalar_select %p899_p2, 1, 0 }
  0x20   : > { %s1077_s11 = scalar_select %p903_p4, 1, 0 }
  0x21   : > { %s1078_s23 = scalar_select %p910_p6, 1, 0 }
  0x22   : > { %p493_p8 = scmp.lt.s32.totalorder %s765_s22, 4  ;;  %s161_s27 = sand.u32 1, %s745_s17  }
  0x23   : > { %s456_s28 = sshll.u32 %s161_s27, 3  ;;  %s457_s30 = sshll.u32 %s761_s21, 1 }
  0x24   : > { %s170_s24 = sadd.s32 %s757_s20, %s457_s30  ;;  %s165_s5 = scalar_lea.vmem [#allocation2], %s456_s28 }
  0x25   : > { %s174_s6 = sshll.u32 %s165_s5, 4  ;;  %s458_s26 = sshll.u32 %s170_s24, 7  ;;  %s175_s6 = int_to_ptr.vmem [resolvable:$true] %s174_s6 }
  0x26   : > { %s172_s8 = scalar_lea.hbm %s1058_s0, %s458_s26  ;;  %p923_p1 = pnand %p493_p8, %p864_p3 }
  0x27   : > { %p459_p5 = scmp.ge.s32.totalorder %s765_s22, 1  ;;  %p186_p9 = scmp.lt.s32.totalorder %s765_s22, 5 }
  0x28   : > { %s162_s17 = scalar_lea.sflag [#allocation3], %s161_s27  ;;  %p589_p10 = pneg %p923_p1 }
  0x29   : > { %s600_s30 = scalar_lea.vmem %s175_s6, 128  ;;  %s767_s28 = smov [#allocation2]  }
  0x2a   : > { %p601_p11 = scmp.ne.s32.totalorder %s175_s6, %s600_s30  ;;  %s605_s24 = sshll.u32 %s767_s28, 4  ;;  %s606_s24 = int_to_ptr.vmem [resolvable:$false] %s605_s24 }
  0x2b   : > { %s607_s25 = scalar_lea.vmem %s606_s24, 256  ;;  %p608_p6 = scmp.lt.s32.totalorder %s175_s6, %s606_s24 }
  0x2c   : > { %p603_p13 = pnand %p601_p11, %p589_p10  ;;  %p609_p4 = scmp.lt.s32.totalorder %s607_s25, %s600_s30 }
  0x2e   : > { %p604_p0 = pneg %p603_p13  ;;  %p610_p3 = por %p609_p4, %p608_p6 }
  0x30   : > { %p611_p8 = pnand %p610_p3, %p604_p0 }
  0x32   : > { %614 = shalt.err (!%p611_p8)
}
  0x33   : > { %485 = dma.hbm_to_vmem [thread:$0]  (!%p923_p1), %s172_s8, 128, %s175_s6, %s162_s17  }
  0x34   : > { %p187_p2 = pnand %p459_p5, %p186_p9 }
  0x35   : > { %s938_s26 = sand.u32 (!%p187_p2), 1, %s741_s16  }
  0x36   : > { %190 = sbr.rel (%p187_p2) target bundleno = 455 (0x1c7), region = 28  ;;  %s460_s29 = sshll.u32 (!%p187_p2), %s938_s26, 3 }
  0x37   : > { %s193_s9 = scalar_lea.sflag (!%p187_p2), [#allocation3], %s938_s26  ;;  %s196_s27 = scalar_lea.vmem (!%p187_p2), [#allocation2], %s460_s29 }
  0x3b   : > { %712 = dma.done.wait (%p876_p7), %s193_s9, 128  }
  0x3c   : > { %714 = vsyncadd (%p876_p7), %s193_s9, 4294967168  ;;  %p228_p2 = scmp.lt.s32.totalorder %s753_s19, 1  ;;  %v768_v0 = vmov 0   ;;  %s218_s4 = sand.u32 1, %s729_s13   ;;  %v234_v3 = vlaneseq  ;;  %v769_v8 = vmov 0.0004032258  }
  0x3d   : > { %586 = vset.pattern.permute.xlu0 %v768_v0  ;;  %s461_s30 = sshll.u32 %s218_s4, 3  ;;  %s464_s28 = sshll.u32 %s749_s18, 7  ;;  %v232_v12 = vld [vmem:[%s196_s27] sm:$0xff] }
  0x3e   : > { %s229_s14 = scalar_select %p228_p2, %s753_s19, 1  ;;  %v235_v4 = vand.u32 127, %v234_v3  ;;  %v237_v5 = vstv %s464_s28 }
  0x3f   : > { %s959_s24 = scalar_lea.vmem [#allocation6], %s460_s29  ;;  %s962_s25 = scalar_lea.vmem [#allocation5], %s461_s30 }
  0x40   : > { %s463_s17 = sshll.u32 %s229_s14, 3  ;;  %v238_v6 = vadd.s32 %v237_v5, %v235_v4  ;;  %p465_p7 = scmp.ne.s32.totalorder %s749_s18, 0 }
  0x41   : > { %s231_s6 = scalar_lea.vmem %s1059_s1, %s463_s17 }
  0x42   : > { %v233_v1 = vld [vmem:[%s231_s6] sm:$0xff]  ;;  %vm244_vm2 = vcmp.eq.s32.totalorder %v238_v6, 0  ;;  %vm253_vm3 = vcmp.lt.s32.totalorder %v238_v6, 250 }
  0x43   : > { %240 = vperm.xlu0 %586, %v233_v1   ;;  %vm246_vm0 = vcmp.eq.s32.totalorder %v233_v1, 0 }
  0x44   : > { %v247_v2 = vsel %vm246_vm0, 1, %v768_v0 }
  0x47   : > { %249 = vperm.xlu0 %586, %v247_v2  }
  0xbe   : > { %v241_v7 = vpop.permute.xlu0 %240 }
  0xbf   : > { %vm242_vm1 = vcmp.eq.s32.totalorder %v238_v6, %v241_v7 }
  0xc0   : > { %v243_v9 = vsel %vm242_vm1, 0.9, %v769_v8 }
  0xc1   : > { %v245_v11 = vsel %vm244_vm2, 0.0, %v243_v9 }
  0xc2   : > { %v250_v10 = vpop.permute.xlu0 %249  ;;  %262 = sbr.rel (%p465_p7) target bundleno = 407 (0x197), region = 36 }
  0xc3   : > { %vm251_vm4 = vcmp.eq.s32.totalorder %v250_v10, 1 }
  0xc4   : > { %v252_v13 = vsel %vm251_vm4, 0.0, %v245_v11 }
  0xc5   : > { %v254_v14 = vsel %vm253_vm3, %v252_v13, 0.0 }
  0xc6   : > { %255 = vst [vmem:[%s959_s24] sm:$0xff] %v254_v14  ;;  %v256_v15 = vmul.f32 %v254_v14, %v232_v12 }
  0xc7   : > { %vm263_vm5 = vcmp.ne.s32.totalorder %v233_v1, 0  ;;  %vm266_vm6 = vcmask 7168   ;;  %v770_v16 = vmov 0.0   ;;  %v278_v26 = vshrl.u32 %v234_v3, 7 }
  0xc8   : > { %v466_v17 = vsel %vm263_vm5, 1.0, %v770_v16  ;;  %vm280_vm8 = vcmp.eq.s32.totalorder %v235_v4, 0 }
  0xc9   : > { %v267_v18 = vsel %vm266_vm6, %v466_v17, 0.0  ;;  %vm279_vm7 = vcmp.eq.s32.totalorder %v278_v26, 0 }
  0xca   : > { %268 = vadd.xlane.f32.xlu0 %v267_v18  ;;  %vm281_vm9 = vmand %vm279_vm7, %vm280_vm8 }
 0x153   : > { %v269_v19 = vpop.xlane.xlu0 %268 }
 0x154   : > { %v270_v20 = vrot.slane %v269_v19, 4 }
 0x156   : > { %v271_v21 = vadd.f32 %v270_v20, %v269_v19 }
 0x158   : > { %v272_v22 = vrot.slane %v271_v21, 2 }
 0x15a   : > { %v273_v23 = vadd.f32 %v272_v22, %v271_v21 }
 0x15c   : > { %v274_v24 = vrot.slane %v273_v23, 1 }
 0x15e   : > { %v275_v25 = vadd.f32 %v274_v24, %v273_v23 }
 0x160   : > { %474 = vpush %v275_v25 }
 0x191   : > { %s475_s29 = spop %474 }
 0x192   : > { %s282_s9 = smul.f32 -0.87642586, %s475_s29 }
 0x194   : > { %v283_v27 = vstv %s282_s9 }
 0x195   : > { %v284_v28 = vsel %vm281_vm9, %v283_v27, 0.0 }
 0x196   : > { %285 = vst [vmem:[%s962_s25] sm:$0xff] %v284_v28 }
 0x197 PF: > { %s469_s27 = sshll.u32 %s753_s19, 7  ;;  %s308_s5 = sshll.u32 %s962_s25, 4  ;;  %s974_s5 = int_to_ptr.vmem [resolvable:$true] %s308_s5 }
 0x198   : > { %s971_s8 = scalar_lea.hbm %s1060_s2, %s469_s27  ;;  %s470_s6 = sshll.u32 %s753_s19, 1 }
 0x199   : > { %s323_s30 = sshll.u32 %s959_s24, 4  ;;  %s290_s28 = scalar_lea.sflag [#allocation4], %s218_s4  ;;  %s324_s30 = int_to_ptr.vmem [resolvable:$true] %s323_s30 }
 0x19a   : > { %s615_s29 = scalar_lea.vmem %s974_s5, 128  ;;  %s771_s9 = smov [#allocation5]  }
 0x19b   : > { %p616_p4 = scmp.ne.s32.totalorder %s974_s5, %s615_s29  ;;  %s619_s14 = sshll.u32 %s771_s9, 4  ;;  %s620_s14 = int_to_ptr.vmem [resolvable:$false] %s619_s14 }
 0x19c   : > { %s621_s27 = scalar_lea.vmem %s620_s14, 256  ;;  %p622_p5 = scmp.lt.s32.totalorder %s974_s5, %s620_s14 }
 0x19d   : > { %v286_v29 = vld [vmem:[%s962_s25] sm:$0xff]  ;;  %p617_p6 = pnand %p616_p4, %p884_p12  ;;  %p623_p9 = scmp.lt.s32.totalorder %s621_s27, %s615_s29 }
 0x19e   : > { %v287_v30 = vsub.f32 %v286_v29, %v256_v15 }
 0x19f   : > { %p618_p1 = pneg %p617_p6  ;;  %p624_p10 = por %p623_p9, %p622_p5 }
 0x1a0   : > { %288 = vst [vmem:[%s962_s25] sm:$0xff] %v287_v30 }
 0x1a1   : > { %p625_p11 = pnand %p624_p10, %p618_p1 }
 0x1a3   : > { %628 = shalt.err (!%p625_p11)
}
 0x1a4   : > { %s629_s19 = scalar_lea.hbm %s971_s8, 128  ;;  %s633_s25 = scalar_lea.hbm %s1060_s2, 256 }
 0x1a5   : > { %p630_p13 = scmp.ne.s32.totalorder %s971_s8, %s629_s19  ;;  %p634_p8 = scmp.lt.s32.totalorder %s971_s8, %s1060_s2 }
 0x1a6   : > { %p635_p2 = scmp.lt.s32.totalorder %s633_s25, %s629_s19 }
 0x1a7   : > { %p631_p0 = pnand %p630_p13, %p884_p12 }
 0x1a8   : > { %p636_p7 = por %p635_p2, %p634_p8 }
 0x1a9   : > { %p632_p3 = pneg %p631_p0 }
 0x1ab   : > { %p637_p4 = pnand %p636_p7, %p632_p3 }
 0x1ad   : > { %640 = shalt.err (!%p637_p4)
}
 0x1ae   : > { %478 = dma.vmem_to_hbm [thread:$0]  (%p884_p12), %s974_s5, 128, %s971_s8, %s290_s28  }
 0x1af   : > { %s319_s29 = sadd.s32 %s749_s18, %s470_s6  ;;  %s295_s17 = scalar_lea.sflag [#allocation7], %s938_s26 }
 0x1b0   : > { %s471_s14 = sshll.u32 %s319_s29, 7  ;;  %s641_s19 = scalar_lea.vmem %s324_s30, 128 }
 0x1b1   : > { %s321_s24 = scalar_lea.hbm %s1061_s3, %s471_s14  ;;  %p642_p6 = scmp.ne.s32.totalorder %s324_s30, %s641_s19 }
 0x1b2   : > { %p1080_p1 = scmp.ne.s32.totalorder %s1076_s10, 0  ;;  %s772_s7 = smov [#allocation6]  }
 0x1b3   : > { %s645_s25 = sshll.u32 %s772_s7, 4  ;;  %s646_s25 = int_to_ptr.vmem [resolvable:$false] %s645_s25 }
 0x1b4   : > { %p643_p5 = pnand %p642_p6, %p1080_p1  ;;  %s647_s9 = scalar_lea.vmem %s646_s25, 256 }
 0x1b5   : > { %p648_p10 = scmp.lt.s32.totalorder %s324_s30, %s646_s25  ;;  %p649_p11 = scmp.lt.s32.totalorder %s647_s9, %s641_s19 }
 0x1b6   : > { %p644_p9 = pneg %p643_p5 }
 0x1b7   : > { %p650_p12 = por %p649_p11, %p648_p10 }
 0x1b9   : > { %p651_p13 = pnand %p650_p12, %p644_p9 }
 0x1bb   : > { %654 = shalt.err (!%p651_p13)
}
 0x1bc   : > { %s655_s18 = scalar_lea.hbm %s321_s24, 128  ;;  %s659_s5 = scalar_lea.hbm %s1061_s3, 512 }
 0x1bd   : > { %p656_p0 = scmp.ne.s32.totalorder %s321_s24, %s655_s18  ;;  %p660_p2 = scmp.lt.s32.totalorder %s321_s24, %s1061_s3 }
 0x1be   : > { %p661_p7 = scmp.lt.s32.totalorder %s659_s5, %s655_s18 }
 0x1bf   : > { %p657_p3 = pnand %p656_p0, %p1080_p1 }
 0x1c0   : > { %p662_p4 = por %p661_p7, %p660_p2 }
 0x1c1   : > { %p658_p8 = pneg %p657_p3 }
 0x1c3   : > { %p663_p6 = pnand %p662_p4, %p658_p8 }
 0x1c5   : > { %666 = shalt.err (!%p663_p6)
}
 0x1c6   : > { %479 = dma.vmem_to_hbm [thread:$0]  (%p1080_p1), %s324_s30, 128, %s321_s24, %s295_s17  }
 0x1c7 PF: > { %p494_p5 = scmp.ge.s32.totalorder %s765_s22, 2  ;;  %s335_s29 = sand.u32 1, %s725_s12  }
 0x1c8   : > { %p1081_p9 = scmp.ne.s32.totalorder %s1077_s11, 0  ;;  %s336_s14 = scalar_lea.sflag [#allocation4], %s335_s29 }
 0x1ca   : > { %p487_p10 = pnand %p494_p5, %p1081_p9 }
 0x1cc   : > { %p488_p11 = pneg %p487_p10 }
 0x1ce   : > { %716 = dma.done.wait (%p488_p11), %s336_s14, 128  }
 0x1cf   : > { %718 = vsyncadd (%p488_p11), %s336_s14, 4294967168  ;;  %s344_s27 = sand.u32 1, %s737_s15   ;;  %p1082_p12 = scmp.ne.s32.totalorder %s1078_s23, 0 }
 0x1d0   : > { %s345_s10 = scalar_lea.sflag [#allocation7], %s344_s27 }
 0x1d1   : > { %p490_p13 = pnand %p494_p5, %p1082_p12 }
 0x1d3   : > { %p491_p0 = pneg %p490_p13 }
 0x1d5   : > { %720 = dma.done.wait (%p491_p0), %s345_s10, 128  }
 0x1d6   : > { %722 = vsyncadd (%p491_p0), %s345_s10, 4294967168  ;;  %s23_s22 = sadd.s32 1, %s765_s22   ;;  %s1083_s30 = sld [smem:[#allocation11_spill]] }
 0x1d7   : > { %p20_p1 = scmp.ge.s32.totalorder %s23_s22, 6   ;;  %s1084_s14 = sld [smem:[#allocation15_spill]] }
 0x1d8   : > { %s1085_s11 = sld [smem:[#allocation12_spill]]  ;;  %s1089_s12 = smov %s729_s13 }
 0x1d9   : > { %s1086_s17 = sld [smem:[#allocation16_spill]]  ;;  %s1091_s15 = smov %s741_s16 }
 0x1da   : > { %s1087_s4 = sld [smem:[#allocation13_spill]]  ;;  %s1093_s18 = smov %s757_s20 }
 0x1db   : > { %s1088_s24 = sld [smem:[#allocation14_spill]]  ;;  %s1094_s19 = smov %s761_s21 }
 0x1dc   : > { %s1090_s13 = smov %s1083_s30 }
 0x1dd   :  { %22 = sbr.rel (!%p20_p1) target bundleno = 11 (0xb), region = 97 }
 0x1de   : > { %s1092_s16 = smov %s1085_s11 }
 0x1e0   : > { %s1095_s20 = smov %s1087_s4 }
 0x1e1   : > { %s1096_s21 = smov %s1088_s24 }
 0x1e2   :  { %350 = vsyncpa [#allocation3], 1 }
 0x1e3   :  { %352 = vsyncpa [#allocation3 + $0x1], 1 }
 0x1e4   :  { %353 = vsyncpa [#allocation4], 1 }
 0x1e5   :  { %355 = vsyncpa [#allocation4 + $0x1], 1 }
 0x1e6   :  { %356 = vsyncpa [#allocation7], 1 }
 0x1e7   :  { %358 = vsyncpa [#allocation7 + $0x1], 1 }

</bundles_post_ra>
